<compile_context>
chip_gen: v5e
topology: v5e:2x2
jax: 0.10.0
libtpu: 0.0.40
codegen_flags: <defaults>
</compile_context>

<pallas_src>
import functools
import math

import jax
import jax.numpy as jnp
from jax import lax
from jax.experimental import pallas as pl
from jax.experimental.pallas import tpu as pltpu

EPS = 1e-10
_INV_LN10 = 1.0 / math.log(10.0)


def _fciou_kernel(pred_ref, ann_ref, loss_ref, pres_ref,
                  num_acc, pp_acc, cnt_acc, *, needs_mask):
    k = pl.program_id(1)
    n_k = pl.num_programs(1)

    @pl.when(k == 0)
    def _():
        num_acc[...] = jnp.zeros_like(num_acc)
        pp_acc[...] = jnp.zeros_like(pp_acc)
        cnt_acc[...] = jnp.zeros_like(cnt_acc)

    x = pred_ref[0].astype(jnp.float32)          # (C, T) logits, f32 compute
    a = ann_ref[0]                               # (1, T) int32 labels

    # Per-pixel softmax over the class (sublane) axis; reciprocal on the EUP
    # slot leaves only a multiply on the VPU.
    m = jnp.max(x, axis=0, keepdims=True)
    e = jnp.exp(x - m)
    s = jnp.sum(e, axis=0, keepdims=True)
    p = e * pl.reciprocal(s, approx=False) + EPS  # (C, T)

    if needs_mask:
        # Padded pixels carry ann == -1; zero their probability mass so they
        # do not pollute the spatial sums (num / cnt are safe automatically).
        p = jnp.where(a >= 0, p, 0.0)

    cls = lax.broadcasted_iota(jnp.int32, x.shape, 0)   # (C, T), built once
    match = cls == a                                    # one-hot mask (C, T)

    # Partial spatial sums; denom is reconstructed at finalize time as
    # pp + cnt - num, and presence is derived from cnt.
    num_acc[...] += jnp.sum(jnp.where(match, p, 0.0), axis=1, keepdims=True)
    pp_acc[...] += jnp.sum(p * p, axis=1, keepdims=True)
    cnt_acc[...] += jnp.sum(match.astype(jnp.float32), axis=1, keepdims=True)

    @pl.when(k == n_k - 1)
    def _():
        num_s = num_acc[...]
        denom_s = pp_acc[...] + cnt_acc[...] - num_s
        iou = num_s / denom_s
        loss_ref[0] = -jnp.log(iou + EPS) * _INV_LN10   # -log10(iou + eps)
        pres_ref[0] = (cnt_acc[...] > 0.0).astype(jnp.float32)


def _round_up(x, m):
    return ((x + m - 1) // m) * m


def fciou_v6(pred, ann, *, tile_hw=None):
    """pred: (B, C, H, W) float logits, ann: (B, H, W) integer labels -> (B,)"""
    B, C, H, W = pred.shape
    HW = H * W
    itemsize = jnp.dtype(pred.dtype).itemsize

    # Pick a spatial tile: big enough to sit near the HBM roofline, small
    # enough that double-buffered pred tiles stay well inside v7x's 64 MiB
    # VMEM (and comfortably under the scoped limit we request below).
    if tile_hw is None:
        tile_budget = 4 * 1024 * 1024                       # bytes / pred tile
        tile_hw = (tile_budget // max(C * itemsize, 1)) // 128 * 128
        tile_hw = max(128, min(8192, tile_hw))
    tile_hw = min(tile_hw, _round_up(HW, 128))
    hw_pad = _round_up(HW, tile_hw)
    n_hw = hw_pad // tile_hw
    needs_mask = hw_pad != HW

    # Keep pred in its native dtype (bf16 halves HBM traffic); cast in-kernel.
    pred_r = pred.reshape(B, C, HW)
    ann_r = ann.reshape(B, 1, HW).astype(jnp.int32)
    if needs_mask:
        pad = hw_pad - HW
        pred_r = jnp.pad(pred_r, ((0, 0), (0, 0), (0, pad)))
        ann_r = jnp.pad(ann_r, ((0, 0), (0, 0), (0, pad)), constant_values=-1)

    dbl_buf_bytes = 2 * (C * tile_hw * itemsize + tile_hw * 4)
    vmem_limit = int(min(max(2 * dbl_buf_bytes + (8 << 20), 16 << 20), 48 << 20))

    kernel = functools.partial(_fciou_kernel, needs_mask=needs_mask)

    # NOTE: on v7x with B == 1, add a leading "parallel" axis that splits HW
    # across the two TensorCores and combine the per-core partials in JAX.
    loss_bc1, pres_bc1 = pl.pallas_call(
        kernel,
        out_shape=(jax.ShapeDtypeStruct((B, C, 1), jnp.float32),
                   jax.ShapeDtypeStruct((B, C, 1), jnp.float32)),
        grid_spec=pltpu.PrefetchScalarGridSpec(
            num_scalar_prefetch=0,
            grid=(B, n_hw),
            in_specs=[pl.BlockSpec((1, C, tile_hw), lambda b, k: (b, 0, k)),
                      pl.BlockSpec((1, 1, tile_hw), lambda b, k: (b, 0, k))],
            out_specs=[pl.BlockSpec((1, C, 1), lambda b, k: (b, 0, 0)),
                       pl.BlockSpec((1, C, 1), lambda b, k: (b, 0, 0))],
            scratch_shapes=[pltpu.VMEM((C, 1), jnp.float32),
                            pltpu.VMEM((C, 1), jnp.float32),
                            pltpu.VMEM((C, 1), jnp.float32)]),
        compiler_params=pltpu.CompilerParams(
            dimension_semantics=("parallel", "arbitrary"),
            vmem_limit_bytes=vmem_limit),
    )(pred_r, ann_r)

    loss = loss_bc1[..., 0]                               # (B, C)
    present = pres_bc1[..., 0].max(axis=0) > 0.0          # (C,)

    # PyTorch quirk reproduced exactly: classes absent from the *entire*
    # annotation tensor are zeroed only in batch element 0.
    loss = loss.at[0].set(jnp.where(present, loss[0], 0.0))
    return jnp.sum(loss, axis=1)                          # (B,)


def _reference(pred, ann):
    """Pure-JAX replica of the PyTorch forward (for a sanity check)."""
    B, C, H, W = pred.shape
    p = jax.nn.softmax(pred.astype(jnp.float32), axis=1) + EPS
    onehot = jax.nn.one_hot(ann.astype(jnp.int32), C, axis=1,
                            dtype=jnp.float32)            # (B, C, H, W)
    num = p * onehot
    denom = p * p + onehot - num
    num = jnp.sum(num, axis=(2, 3))
    denom = jnp.sum(denom, axis=(2, 3))
    loss = -jnp.log10(num / denom + EPS)
    present = jnp.array([(ann == c).any() for c in range(C)])
    loss = loss.at[0].set(jnp.where(present, loss[0], 0.0))
    return jnp.sum(loss, axis=1)


if __name__ == "__main__":
    key = jax.random.PRNGKey(0)

    # Test 1: f32 logits, spatial size that needs no padding (single HW tile).
    k1, k2, k3, k4 = jax.random.split(key, 4)
    B, C, H, W = 2, 4, 16, 16
    pred = jax.random.normal(k1, (B, C, H, W), dtype=jnp.float32)
    ann = jax.random.randint(k2, (B, H, W), 0, C, dtype=jnp.int32)
    out = jax.block_until_ready(fciou_v6(pred, ann))
    ref = _reference(pred, ann)
    assert out.shape == (B,)
    assert jnp.allclose(out, ref, rtol=1e-4, atol=1e-4), (out, ref)

    # Test 2: bf16 logits + ragged spatial tail, forcing multi-tile
    # accumulation and the padded-pixel mask path.
    H2 = W2 = 12
    pred2 = jax.random.normal(k3, (B, C, H2, W2), dtype=jnp.bfloat16)
    ann2 = jax.random.randint(k4, (B, H2, W2), 0, C, dtype=jnp.int32)
    out2 = jax.block_until_ready(fciou_v6(pred2, ann2, tile_hw=128))
    ref2 = _reference(pred2, ann2)
    assert out2.shape == (B,)
    assert jnp.allclose(out2, ref2, rtol=1e-4, atol=1e-4), (out2, ref2)

    print("KERNEL_OK")
</pallas_src>

<mosaic_0001>
module attributes {stable_mosaic.version = 11 : i64} {
  func.func @_fciou_kernel(%arg0: i32, %arg1: i32, %arg2: memref<1x4x256xf32, #tpu.memory_space<vmem>>, %arg3: memref<1x1x256xi32, #tpu.memory_space<vmem>>, %arg4: memref<1x4x1xf32, #tpu.memory_space<vmem>>, %arg5: memref<1x4x1xf32, #tpu.memory_space<vmem>>, %arg6: memref<4x1xf32, #tpu.memory_space<vmem>>, %arg7: memref<4x1xf32, #tpu.memory_space<vmem>>, %arg8: memref<4x1xf32, #tpu.memory_space<vmem>>) attributes {dimension_semantics = [#tpu.dimension_semantics<parallel>, #tpu.dimension_semantics<arbitrary>], iteration_bounds = array<i64: 2, 1>, scalar_prefetch = 0 : i64, scratch_operands = 3 : i64, tpu.core_type = #tpu.core_type<tc>, window_params = [{transform_indices = @transform_0, window_bounds = array<i64: 1, 4, 256>}, {transform_indices = @transform_1, window_bounds = array<i64: 1, 1, 256>}, {transform_indices = @transform_2, window_bounds = array<i64: 1, 4, 1>}, {transform_indices = @transform_3, window_bounds = array<i64: 1, 4, 1>}]} {
    %c0_i32 = arith.constant 0 : i32
    %0 = arith.cmpi eq, %arg1, %c0_i32 : i32
    %1 = arith.extui %0 : i1 to i32
    %c0_i32_0 = arith.constant 0 : i32
    %2 = arith.cmpi ne, %1, %c0_i32_0 : i32
    scf.if %2 {
      %cst_26 = arith.constant 0.000000e+00 : f32
      %45 = vector.broadcast %cst_26 : f32 to vector<4x1xf32>
      %c0_27 = arith.constant 0 : index
      %c0_28 = arith.constant 0 : index
      %46 = vector.load %arg6[%c0_27, %c0_28] : memref<4x1xf32, #tpu.memory_space<vmem>>, vector<4x1xf32>
      tpu.vector_store %arg6[%c0_27, %c0_28], %45 {strides = array<i32>} : memref<4x1xf32, #tpu.memory_space<vmem>>, vector<4x1xf32>,
      %cst_29 = arith.constant 0.000000e+00 : f32
      %47 = vector.broadcast %cst_29 : f32 to vector<4x1xf32>
      %c0_30 = arith.constant 0 : index
      %c0_31 = arith.constant 0 : index
      %48 = vector.load %arg7[%c0_30, %c0_31] : memref<4x1xf32, #tpu.memory_space<vmem>>, vector<4x1xf32>
      tpu.vector_store %arg7[%c0_30, %c0_31], %47 {strides = array<i32>} : memref<4x1xf32, #tpu.memory_space<vmem>>, vector<4x1xf32>,
      %cst_32 = arith.constant 0.000000e+00 : f32
      %49 = vector.broadcast %cst_32 : f32 to vector<4x1xf32>
      %c0_33 = arith.constant 0 : index
      %c0_34 = arith.constant 0 : index
      %50 = vector.load %arg8[%c0_33, %c0_34] : memref<4x1xf32, #tpu.memory_space<vmem>>, vector<4x1xf32>
      tpu.vector_store %arg8[%c0_33, %c0_34], %49 {strides = array<i32>} : memref<4x1xf32, #tpu.memory_space<vmem>>, vector<4x1xf32>,
    } else {
    }
    %c0 = arith.constant 0 : index
    %c0_1 = arith.constant 0 : index
    %c0_2 = arith.constant 0 : index
    %3 = vector.load %arg2[%c0, %c0_1, %c0_2] : memref<1x4x256xf32, #tpu.memory_space<vmem>>, vector<1x4x256xf32>
    %4 = vector.shape_cast %3 : vector<1x4x256xf32> to vector<4x256xf32>
    %c0_3 = arith.constant 0 : index
    %c0_4 = arith.constant 0 : index
    %c0_5 = arith.constant 0 : index
    %5 = vector.load %arg3[%c0_3, %c0_4, %c0_5] : memref<1x1x256xi32, #tpu.memory_space<vmem>>, vector<1x1x256xi32>
    %6 = vector.shape_cast %5 : vector<1x1x256xi32> to vector<1x256xi32>
    %cst = arith.constant dense<0xFF800000> : vector<256xf32>
    %7 = vector.multi_reduction <maximumf>, %4, %cst [0] : vector<4x256xf32> to vector<256xf32>
    %8 = vector.shape_cast %7 : vector<256xf32> to vector<1x256xf32>
    %9 = vector.broadcast %8 : vector<1x256xf32> to vector<4x256xf32>
    %10 = arith.subf %4, %9 : vector<4x256xf32>
    %11 = math.exp %10 : vector<4x256xf32>
    %cst_6 = arith.constant dense<0.000000e+00> : vector<256xf32>
    %12 = vector.multi_reduction <add>, %11, %cst_6 [0] : vector<4x256xf32> to vector<256xf32>
    %13 = vector.shape_cast %12 : vector<256xf32> to vector<1x256xf32>
    %14 = tpu.reciprocal %13 : vector<1x256xf32> -> vector<1x256xf32>
    %15 = vector.broadcast %14 : vector<1x256xf32> to vector<4x256xf32>
    %16 = arith.mulf %11, %15 : vector<4x256xf32>
    %cst_7 = arith.constant 1.000000e-10 : f32
    %17 = vector.broadcast %cst_7 : f32 to vector<4x256xf32>
    %18 = arith.addf %16, %17 : vector<4x256xf32>
    %19 = tpu.iota {dimensions = array<i32: 0>} : vector<4x256xi32>
    %20 = vector.broadcast %6 : vector<1x256xi32> to vector<4x256xi32>
    %21 = arith.cmpi eq, %19, %20 : vector<4x256xi32>
    %c0_8 = arith.constant 0 : index
    %c0_9 = arith.constant 0 : index
    %22 = vector.load %arg6[%c0_8, %c0_9] : memref<4x1xf32, #tpu.memory_space<vmem>>, vector<4x1xf32>
    %cst_10 = arith.constant 0.000000e+00 : f32
    %23 = vector.broadcast %cst_10 : f32 to vector<4x256xf32>
    %24 = arith.select %21, %18, %23 : vector<4x256xi1>, vector<4x256xf32>
    %cst_11 = arith.constant dense<0.000000e+00> : vector<4xf32>
    %25 = vector.multi_reduction <add>, %24, %cst_11 [1] : vector<4x256xf32> to vector<4xf32>
    %26 = vector.shape_cast %25 : vector<4xf32> to vector<4x1xf32>
    %27 = arith.addf %22, %26 : vector<4x1xf32>
    %c0_12 = arith.constant 0 : index
    %c0_13 = arith.constant 0 : index
    %28 = vector.load %arg6[%c0_12, %c0_13] : memref<4x1xf32, #tpu.memory_space<vmem>>, vector<4x1xf32>
    tpu.vector_store %arg6[%c0_12, %c0_13], %27 {strides = array<i32>} : memref<4x1xf32, #tpu.memory_space<vmem>>, vector<4x1xf32>,
    %c0_14 = arith.constant 0 : index
    %c0_15 = arith.constant 0 : index
    %29 = vector.load %arg7[%c0_14, %c0_15] : memref<4x1xf32, #tpu.memory_space<vmem>>, vector<4x1xf32>
    %30 = arith.mulf %18, %18 : vector<4x256xf32>
    %cst_16 = arith.constant dense<0.000000e+00> : vector<4xf32>
    %31 = vector.multi_reduction <add>, %30, %cst_16 [1] : vector<4x256xf32> to vector<4xf32>
    %32 = vector.shape_cast %31 : vector<4xf32> to vector<4x1xf32>
    %33 = arith.addf %29, %32 : vector<4x1xf32>
    %c0_17 = arith.constant 0 : index
    %c0_18 = arith.constant 0 : index
    %34 = vector.load %arg7[%c0_17, %c0_18] : memref<4x1xf32, #tpu.memory_space<vmem>>, vector<4x1xf32>
    tpu.vector_store %arg7[%c0_17, %c0_18], %33 {strides = array<i32>} : memref<4x1xf32, #tpu.memory_space<vmem>>, vector<4x1xf32>,
    %c0_19 = arith.constant 0 : index
    %c0_20 = arith.constant 0 : index
    %35 = vector.load %arg8[%c0_19, %c0_20] : memref<4x1xf32, #tpu.memory_space<vmem>>, vector<4x1xf32>
    %36 = arith.extui %21 : vector<4x256xi1> to vector<4x256xi32>
    %37 = arith.sitofp %36 : vector<4x256xi32> to vector<4x256xf32>
    %cst_21 = arith.constant dense<0.000000e+00> : vector<4xf32>
    %38 = vector.multi_reduction <add>, %37, %cst_21 [1] : vector<4x256xf32> to vector<4xf32>
    %39 = vector.shape_cast %38 : vector<4xf32> to vector<4x1xf32>
    %40 = arith.addf %35, %39 : vector<4x1xf32>
    %c0_22 = arith.constant 0 : index
    %c0_23 = arith.constant 0 : index
    %41 = vector.load %arg8[%c0_22, %c0_23] : memref<4x1xf32, #tpu.memory_space<vmem>>, vector<4x1xf32>
    tpu.vector_store %arg8[%c0_22, %c0_23], %40 {strides = array<i32>} : memref<4x1xf32, #tpu.memory_space<vmem>>, vector<4x1xf32>,
    %c0_i32_24 = arith.constant 0 : i32
    %42 = arith.cmpi eq, %arg1, %c0_i32_24 : i32
    %43 = arith.extui %42 : i1 to i32
    %c0_i32_25 = arith.constant 0 : i32
    %44 = arith.cmpi ne, %43, %c0_i32_25 : i32
    scf.if %44 {
      %c0_26 = arith.constant 0 : index
      %c0_27 = arith.constant 0 : index
      %45 = vector.load %arg6[%c0_26, %c0_27] : memref<4x1xf32, #tpu.memory_space<vmem>>, vector<4x1xf32>
      %c0_28 = arith.constant 0 : index
      %c0_29 = arith.constant 0 : index
      %46 = vector.load %arg7[%c0_28, %c0_29] : memref<4x1xf32, #tpu.memory_space<vmem>>, vector<4x1xf32>
      %c0_30 = arith.constant 0 : index
      %c0_31 = arith.constant 0 : index
      %47 = vector.load %arg8[%c0_30, %c0_31] : memref<4x1xf32, #tpu.memory_space<vmem>>, vector<4x1xf32>
      %48 = arith.addf %46, %47 : vector<4x1xf32>
      %49 = arith.subf %48, %45 : vector<4x1xf32>
      %50 = arith.divf %45, %49 : vector<4x1xf32>
      %cst_32 = arith.constant 1.000000e-10 : f32
      %51 = vector.broadcast %cst_32 : f32 to vector<4x1xf32>
      %52 = arith.addf %50, %51 : vector<4x1xf32>
      %53 = math.log %52 : vector<4x1xf32>
      %cst_33 = arith.constant 0.000000e+00 : f32
      %54 = vector.broadcast %cst_33 : f32 to vector<4x1xf32>
      %55 = arith.subf %54, %53 : vector<4x1xf32>
      %cst_34 = arith.constant 0.434294492 : f32
      %56 = vector.broadcast %cst_34 : f32 to vector<4x1xf32>
      %57 = arith.mulf %55, %56 : vector<4x1xf32>
      %c0_35 = arith.constant 0 : index
      %c0_36 = arith.constant 0 : index
      %c0_37 = arith.constant 0 : index
      %58 = vector.load %arg4[%c0_35, %c0_36, %c0_37] : memref<1x4x1xf32, #tpu.memory_space<vmem>>, vector<1x4x1xf32>
      %59 = vector.shape_cast %58 : vector<1x4x1xf32> to vector<4x1xf32>
      %60 = vector.shape_cast %57 : vector<4x1xf32> to vector<1x4x1xf32>
      tpu.vector_store %arg4[%c0_35, %c0_36, %c0_37], %60 {strides = array<i32>} : memref<1x4x1xf32, #tpu.memory_space<vmem>>, vector<1x4x1xf32>,
      %c0_38 = arith.constant 0 : index
      %c0_39 = arith.constant 0 : index
      %61 = vector.load %arg8[%c0_38, %c0_39] : memref<4x1xf32, #tpu.memory_space<vmem>>, vector<4x1xf32>
      %cst_40 = arith.constant 0.000000e+00 : f32
      %62 = vector.broadcast %cst_40 : f32 to vector<4x1xf32>
      %63 = arith.cmpf ogt, %61, %62 : vector<4x1xf32>
      %64 = arith.extui %63 : vector<4x1xi1> to vector<4x1xi32>
      %65 = arith.sitofp %64 : vector<4x1xi32> to vector<4x1xf32>
      %c0_41 = arith.constant 0 : index
      %c0_42 = arith.constant 0 : index
      %c0_43 = arith.constant 0 : index
      %66 = vector.load %arg5[%c0_41, %c0_42, %c0_43] : memref<1x4x1xf32, #tpu.memory_space<vmem>>, vector<1x4x1xf32>
      %67 = vector.shape_cast %66 : vector<1x4x1xf32> to vector<4x1xf32>
      %68 = vector.shape_cast %65 : vector<4x1xf32> to vector<1x4x1xf32>
      tpu.vector_store %arg5[%c0_41, %c0_42, %c0_43], %68 {strides = array<i32>} : memref<1x4x1xf32, #tpu.memory_space<vmem>>, vector<1x4x1xf32>,
    } else {
    }
    return
  }
  func.func @transform_0(%arg0: i32, %arg1: i32) -> (i32, i32, i32) {
    %c0_i32 = arith.constant 0 : i32
    %c0_i32_0 = arith.constant 0 : i32
    return %arg0, %c0_i32, %arg1 : i32, i32, i32
  }
  func.func @transform_1(%arg0: i32, %arg1: i32) -> (i32, i32, i32) {
    %c0_i32 = arith.constant 0 : i32
    %c0_i32_0 = arith.constant 0 : i32
    return %arg0, %c0_i32, %arg1 : i32, i32, i32
  }
  func.func @transform_2(%arg0: i32, %arg1: i32) -> (i32, i32, i32) {
    %c0_i32 = arith.constant 0 : i32
    %c0_i32_0 = arith.constant 0 : i32
    %c0_i32_1 = arith.constant 0 : i32
    return %arg0, %c0_i32, %c0_i32_0 : i32, i32, i32
  }
  func.func @transform_3(%arg0: i32, %arg1: i32) -> (i32, i32, i32) {
    %c0_i32 = arith.constant 0 : i32
    %c0_i32_0 = arith.constant 0 : i32
    %c0_i32_1 = arith.constant 0 : i32
    return %arg0, %c0_i32, %c0_i32_0 : i32, i32, i32
  }
}

</mosaic_0001>

<bundles_post_ra>
// kernel: tpu_custom_call.1
= control target key start
LH: loop header
LB: loop body
LE: loop exit
PB: predicated region body
PF: predicated region fallthrough
CT: control target
= control target key end

     0   :  { %9 = vsyncpa [#allocation6], 0  ;;  %s936_s0 = inlined_call_operand.hbm [shape: f32[2,4,256], index: 0, kind: input, shape index: {}]   ;;  %s937_s1 = inlined_call_operand.hbm [shape: s32[2,1,256], index: 1, kind: input, shape index: {}]   ;;  %s938_s2 = inlined_call_operand.vmem [shape: f32[2,4,1], index: 2, kind: output, shape index: {0}]   ;;  %s939_s3 = inlined_call_operand.vmem [shape: f32[2,4,1], index: 3, kind: output, shape index: {1}]  }
   0x1   :  { %11 = vsyncpa [#allocation6 + $0x1], 0 }
   0x2   :  { %12 = vsyncpa [#allocation8], 0 }
   0x3   :  { %14 = vsyncpa [#allocation8 + $0x1], 0  ;;  %s799_s12 = smov 0   ;;  %s801_s13 = smov 0  }
   0x4   :  { %s803_s14 = smov 0   ;;  %s805_s15 = smov 0  }
   0x5   :  { %s807_s16 = smov 0   ;;  %s809_s17 = smov 0  }
   0x6 LB: > { %s571_s18 = sadd.s32 4294967295, %s776_s17   ;;  %s32_s19 = sadd.s32 1, %s772_s16  ;;  %s776_s17 = sphi %s809_s17, %s20_s17   ;;  %s772_s16 = sphi %s807_s16, %s947_s16   ;;  %s768_s15 = sphi %s805_s15, %s946_s15   ;;  %s764_s14 = sphi %s803_s14, %s945_s14   ;;  %s760_s13 = sphi %s801_s13, %s944_s13   ;;  %s756_s12 = sphi %s799_s12, %s943_s12  }
   0x7   : > { %p34_p0 = scmp.ge.s32.totalorder %s32_s19, 2  ;;  %s41_s20 = sadd.s32 1, %s764_s14 }
   0x8   : > { %p48_p1 = scmp.ne.s32.totalorder %s764_s14, %s760_s13  ;;  %p49_p2 = scmp.eq.s32.totalorder %s776_s17, 0 }
   0x9   : > { %s949_s19 = smov (%p34_p0, %s32_s19), 0  ;;  %p54_p4 = scmp.ne.s32.totalorder %s760_s13, %s756_s12 }
   0xa   : > { %p835_p3 = por %p49_p2, %p48_p1  ;;  %s36_s22 = ssub.s32 %s772_s16, %s949_s19 }
   0xb   : > { %p55_p5 = scmp.eq.s32.totalorder %s571_s18, 0  ;;  %p39_p6 = scmp.eq.s32.totalorder %s36_s22, 0 }
   0xc   : > { %p602_p8 = scmp.lt.s32.totalorder %s776_s17, 2  ;;  %s158_s25 = sand.u32 1, %s764_s14  }
   0xd   : > { %p842_p7 = por %p55_p5, %p54_p4  ;;  %s590_s26 = sshll.u32 %s772_s16, 3 }
   0xe   : > { %s848_s24 = scalar_select %p39_p6, %s764_s14, %s41_s20  }
   0xf   : > { %s575_s27 = sshll.u32 %s158_s25, 3  ;;  %s169_s30 = scalar_lea.hbm %s936_s0, %s590_s26 }
  0x10   : > { %s171_s4 = sshll.u32 %s169_s30, 4  ;;  %s162_s5 = scalar_lea.vmem [#allocation5], %s575_s27  ;;  %s172_s4 = int_to_ptr.hbm [resolvable:$true] %s171_s4 }
  0x11   : > { %s173_s6 = sshll.u32 %s162_s5, 4  ;;  %p857_p9 = pnand %p602_p8, %p835_p3  ;;  %s174_s6 = int_to_ptr.vmem [resolvable:$true] %s173_s6 }
  0x12   : > { %p580_p10 = scmp.ge.s32.totalorder %s776_s17, 1  ;;  %p199_p11 = scmp.lt.s32.totalorder %s776_s17, 3 }
  0x13   : > { %s578_s8 = sshll.u32 %s158_s25, 1  ;;  %s159_s9 = scalar_lea.sflag [#allocation6], %s158_s25 }
  0x14   : > { %598 = dma.hbm_to_vmem [thread:$0]  (!%p857_p9), %s172_s4, 128, %s174_s6, %s159_s9  }
  0x15   : > { %p200_p12 = pnand %p580_p10, %p199_p11  ;;  %s579_s10 = sshll.u32 %s772_s16, 1 }
  0x16   : > { %s184_s11 = scalar_lea.vmem [#allocation7], %s578_s8  ;;  %s190_s21 = scalar_lea.hbm %s937_s1, %s579_s10 }
  0x17   : > { %s194_s12 = sshll.u32 %s184_s11, 4  ;;  %s192_s22 = sshll.u32 %s190_s21, 4  ;;  %s195_s12 = int_to_ptr.vmem [resolvable:$true] %s194_s12  ;;  %s193_s22 = int_to_ptr.hbm [resolvable:$true] %s192_s22 }
  0x18   : > { %s181_s26 = scalar_lea.sflag [#allocation8], %s158_s25  ;;  %203 = sbr.rel (%p200_p12) target bundleno = 307 (0x133), region = 28 }
  0x19   : > { %601 = dma.hbm_to_vmem [thread:$0]  (!%p857_p9), %s193_s22, 32, %s195_s12, %s181_s26  }
  0x1a   : > { %s205_s27 = sand.u32 (!%p200_p12), 1, %s760_s13  }
  0x1b   : > { %s581_s28 = sshll.u32 (!%p200_p12), %s205_s27, 3  ;;  %s206_s29 = scalar_lea.sflag (!%p200_p12), [#allocation6], %s205_s27 }
  0x1c   : > { %s209_s30 = scalar_lea.vmem (!%p200_p12), [#allocation5], %s581_s28 }
  0x1d   : > { %747 = dma.done.wait (%p842_p7), %s206_s29, 128  }
  0x1e   : > { %749 = vsyncadd (%p842_p7), %s206_s29, 4294967168  ;;  %s582_s4 = sshll.u32 %s205_s27, 1  ;;  %s216_s5 = scalar_lea.sflag [#allocation8], %s205_s27 }
  0x1f   : > { %s876_s6 = scalar_lea.vmem [#allocation7], %s582_s4 }
  0x20   : > { %751 = dma.done.wait (%p842_p7), %s216_s5, 32  }
  0x21   : > { %753 = vsyncadd (%p842_p7), %s216_s5, 4294967264  ;;  %v269_v0 = vld [vmem:[%s209_s30] sm:$0xff]  ;;  %vm277_vm0 = vcmask 1043456   ;;  %vm265_vm9 = vcmask 3072   ;;  %v778_v61 = vmov 0.0   ;;  %v355_v63 = vlaneseq  ;;  %p253_p13 = scmp.lt.s32.totalorder %s768_s15, 1 }
  0x22   : > { %272 = vst [vmem:[#allocation1] ss:$2 sm:$0xff] %v269_v0 }
  0x23   : > { %267 = vst.msk [vmem:[#allocation3] sm:$0xf] %vm265_vm9, %v778_v61  ;;  %s951_s15 = smov (!%p253_p13, %s768_s15), 1 }
  0x24   : > { %266 = vst.msk [vmem:[#allocation2] sm:$0xf] %vm265_vm9, %v778_v61  ;;  %s583_s23 = sshll.u32 %s951_s15, 2 }
  0x25   : > { %268 = vst.msk [vmem:[#allocation4] sm:$0xf] %vm265_vm9, %v778_v61  ;;  %s260_s8 = scalar_lea.vmem %s939_s3, %s583_s23  ;;  %s256_s11 = scalar_lea.vmem %s938_s2, %s583_s23 }
  0x29   : > { %v273_v1 = vld.sshfl [vmem:[#allocation1] sm:$0xff pattern:$0x75316420]  ;;  %v274_v2 = vld.sshfl [vmem:[#allocation1 + $0x8] sm:$0xff pattern:$0x75316420] }
  0x2a   : > { %v278_v3 = vsel %vm277_vm0, %v273_v1, -inf  ;;  %v285_v4 = vsel %vm277_vm0, %v274_v2, -inf  ;;  %v356_v1 = vshrl.u32 %v355_v63, 7 }
  0x2b   : > { %v279_v5 = vrot.slane %v278_v3, 4  ;;  %v286_v6 = vrot.slane %v285_v4, 4 }
  0x2d   : > { %v280_v7 = vmax.f32 %v278_v3, %v279_v5  ;;  %v287_v8 = vmax.f32 %v285_v4, %v286_v6 }
  0x2f   : > { %v281_v9 = vrot.slane %v280_v7, 2  ;;  %v288_v10 = vrot.slane %v287_v8, 2 }
  0x31   : > { %v282_v11 = vmax.f32 %v280_v7, %v281_v9  ;;  %v289_v12 = vmax.f32 %v287_v8, %v288_v10 }
  0x33   : > { %v283_v13 = vrot.slane %v282_v11, 1  ;;  %v290_v14 = vrot.slane %v289_v12, 1 }
  0x35   : > { %v284_v15 = vmax.f32 %v282_v11, %v283_v13  ;;  %v291_v16 = vmax.f32 %v289_v12, %v290_v14 }
  0x37   : > { %v294_v17 = vrot.slane %v291_v16, 4 }
  0x39   : > { %v295_v18 = vsel %vm277_vm0, %v284_v15, %v294_v17 }
  0x3a   : > { %v297_v19 = vsub.f32 %v269_v0, %v295_v18  ;;  %v270_v0 = vld [vmem:[%s876_s6] sm:$0x3] }
  0x3b   : > { %v357_v2 = vperm.slane %v270_v0, 0  ;;  %v358_v3 = vperm.slane %v270_v0, 1 }
  0x3c   : > { %v298_v20 = vmul.f32 1.442695, %v297_v19 }
  0x3d   : > { %vm359_vm10 = vcmp.eq.s32.totalorder %v356_v1, %v357_v2  ;;  %vm360_vm11 = vcmp.eq.s32.totalorder %v356_v1, %v358_v3 }
  0x3e   : > { %652 = vpow2.f32 %v298_v20  ;;  %v585_v17 = vsel %vm359_vm10, 1.0, %v778_v61  ;;  %v586_v18 = vsel %vm360_vm11, 1.0, %v778_v61 }
  0x3f   : > { %v398_v19 = vsel %vm277_vm0, %v585_v17, 0.0  ;;  %v399_v20 = vsel %vm277_vm0, %v586_v18, 0.0 }
  0x44   : > { %v653_v21 = vpop.eup %652 }
  0x45   : > { %301 = vst [vmem:[#allocation1] ss:$2 sm:$0xff] %v653_v21 }
  0x4c   : > { %v302_v22 = vld.sshfl [vmem:[#allocation1] sm:$0xff pattern:$0x75316420]  ;;  %v303_v23 = vld.sshfl [vmem:[#allocation1 + $0x8] sm:$0xff pattern:$0x75316420] }
  0x4d   : > { %v306_v24 = vsel %vm277_vm0, %v302_v22, 0.0  ;;  %v313_v25 = vsel %vm277_vm0, %v303_v23, 0.0  ;;  %v361_v22 = vld [vmem:[#allocation2] sm:$0xf] }
  0x4e   : > { %v307_v26 = vrot.slane %v306_v24, 4  ;;  %v314_v27 = vrot.slane %v313_v25, 4 }
  0x50   : > { %v308_v28 = vadd.f32 %v307_v26, %v306_v24  ;;  %v315_v29 = vadd.f32 %v314_v27, %v313_v25  ;;  %v378_v25 = vld [vmem:[#allocation3] sm:$0xf] }
  0x52   : > { %v309_v30 = vrot.slane %v308_v28, 2  ;;  %v316_v31 = vrot.slane %v315_v29, 2 }
  0x54   : > { %v310_v32 = vadd.f32 %v309_v30, %v308_v28  ;;  %v317_v33 = vadd.f32 %v316_v31, %v315_v29  ;;  %v393_v28 = vld [vmem:[#allocation4] sm:$0xf] }
  0x56   : > { %v311_v34 = vrot.slane %v310_v32, 1  ;;  %v318_v35 = vrot.slane %v317_v33, 1 }
  0x58   : > { %v312_v36 = vadd.f32 %v311_v34, %v310_v32  ;;  %v319_v37 = vadd.f32 %v318_v35, %v317_v33 }
  0x5a   : > { %654 = vrcp.f32 %v312_v36  ;;  %vm325_vm1 = vweird.f32 %v312_v36  ;;  %v329_v41 = vand.u32 2147483647, %v312_v36  ;;  %v331_v44 = vand.u32 2147483648, %v312_v36 }
  0x5b   : > { %656 = vrcp.f32 %v319_v37  ;;  %v345_v45 = vand.u32 2147483648, %v319_v37  ;;  %vm339_vm3 = vweird.f32 %v319_v37  ;;  %v343_v47 = vand.u32 2147483647, %v319_v37 }
  0x5c   : > { %v332_v51 = vor.u32 1.1754944e-38, %v331_v44  ;;  %vm330_vm7 = vcmp.eq.f32.partialorder %v329_v41, 8.507059e+37 }
  0x5d   : > { %v346_v52 = vor.u32 1.1754944e-38, %v345_v45  ;;  %vm344_vm8 = vcmp.eq.f32.partialorder %v343_v47, 8.507059e+37 }
  0x60   : > { %v655_v38 = vpop.eup %654 }
  0x61   : > { %v657_v39 = vpop.eup %656  ;;  %v321_v40 = vmul.f32 %v655_v38, %v312_v36  ;;  %vm326_vm2 = vweird.f32 %v655_v38 }
  0x62   : > { %v335_v42 = vmul.f32 %v657_v39, %v319_v37  ;;  %vm340_vm4 = vweird.f32 %v657_v39  ;;  %vm327_vm5 = vmor %vm325_vm1, %vm326_vm2 }
  0x63   : > { %v322_v43 = vsub.f32 1.0, %v321_v40  ;;  %vm341_vm6 = vmor %vm339_vm3, %vm340_vm4 }
  0x64   : > { %v336_v46 = vsub.f32 1.0, %v335_v42 }
  0x65   : > { %v323_v48 = vmul.f32 %v655_v38, %v322_v43 }
  0x66   : > { %v337_v49 = vmul.f32 %v657_v39, %v336_v46 }
  0x67   : > { %v324_v50 = vadd.f32 %v655_v38, %v323_v48 }
  0x68   : > { %v338_v53 = vadd.f32 %v657_v39, %v337_v49 }
  0x69   : > { %v328_v54 = vsel %vm327_vm5, %v655_v38, %v324_v50 }
  0x6a   : > { %v342_v55 = vsel %vm341_vm6, %v657_v39, %v338_v53  ;;  %v333_v56 = vsel %vm330_vm7, %v332_v51, %v328_v54 }
  0x6b   : > { %v347_v57 = vsel %vm344_vm8, %v346_v52, %v342_v55 }
  0x6c   : > { %v350_v58 = vrot.slane %v347_v57, 4 }
  0x6e   : > { %v351_v59 = vsel %vm277_vm0, %v333_v56, %v350_v58 }
  0x6f   : > { %v353_v60 = vmul.f32 %v653_v21, %v351_v59  ;;  %v400_v21 = vadd.f32 %v399_v20, %v398_v19 }
  0x71   : > { %v354_v62 = vadd.f32 1e-10, %v353_v60 }
  0x73   : > { %363 = vst [vmem:[#allocation1] ss:$2 sm:$0xff] %v354_v62  ;;  %v379_v4 = vmul.f32 %v354_v62, %v354_v62 }
  0x7a   : > { %v364_v5 = vld.sshfl [vmem:[#allocation1] sm:$0xff pattern:$0x75316420]  ;;  %v365_v6 = vld.sshfl [vmem:[#allocation1 + $0x8] sm:$0xff pattern:$0x75316420] }
  0x7b   : > { %381 = vst [vmem:[#allocation1] ss:$2 sm:$0xff] %v379_v4  ;;  %v368_v7 = vsel %vm359_vm10, %v364_v5, 0.0  ;;  %v369_v8 = vsel %vm360_vm11, %v365_v6, 0.0 }
  0x7c   : > { %v370_v9 = vsel %vm277_vm0, %v368_v7, 0.0  ;;  %v371_v10 = vsel %vm277_vm0, %v369_v8, 0.0 }
  0x7d   : > { %v372_v11 = vadd.f32 %v371_v10, %v370_v9 }
  0x7f   : > { %373 = vadd.xlane.f32.xlu1 %v372_v11 }
  0x82   : > { %v382_v12 = vld.sshfl [vmem:[#allocation1] sm:$0xff pattern:$0x75316420]  ;;  %v383_v13 = vld.sshfl [vmem:[#allocation1 + $0x8] sm:$0xff pattern:$0x75316420] }
  0x83   : > { %v386_v14 = vsel %vm277_vm0, %v382_v12, 0.0  ;;  %v387_v15 = vsel %vm277_vm0, %v383_v13, 0.0 }
  0x84   : > { %v388_v16 = vadd.f32 %v387_v15, %v386_v14 }
  0x86   : > { %389 = vadd.xlane.f32.xlu0 %v388_v16 }
  0x8e   : > { %401 = vadd.xlane.f32.xlu0 %v400_v21 }
  0xf2   : > { %v374_v23 = vpop.xlane.xlu1 %373 }
  0xf3   : > { %v375_v24 = vadd.f32 %v374_v23, %v361_v22 }
  0xf5   : > { %377 = vst.msk [vmem:[#allocation2] sm:$0xf] %vm265_vm9, %v375_v24 }
  0xf9   : > { %v390_v26 = vpop.xlane.xlu0 %389 }
  0xfa   : > { %v391_v27 = vadd.f32 %v390_v26, %v378_v25 }
  0xfc   : > { %392 = vst.msk [vmem:[#allocation3] sm:$0xf] %vm265_vm9, %v391_v27  ;;  %v408_v31 = vld [vmem:[#allocation2] sm:$0xf] }
 0x101   : > { %v402_v29 = vpop.xlane.xlu0 %401 }
 0x102   : > { %v403_v30 = vadd.f32 %v402_v29, %v393_v28 }
 0x103   : > { %v409_v32 = vld [vmem:[#allocation3] sm:$0xf] }
 0x104   : > { %404 = vst.msk [vmem:[#allocation4] sm:$0xf] %vm265_vm9, %v403_v30 }
 0x10b   : > { %v410_v33 = vld [vmem:[#allocation4] sm:$0xf] }
 0x10c   : > { %v434_v34 = vld [vmem:[#allocation4] sm:$0xf]  ;;  %v411_v35 = vadd.f32 %v410_v33, %v409_v32 }
 0x10d   : > { %vm435_vm12 = vcmp.gt.f32.partialorder %v434_v34, 0.0 }
 0x10e   : > { %v587_v36 = vsel %vm435_vm12, 1.0, %v778_v61  ;;  %v412_v37 = vsub.f32 %v411_v35, %v408_v31 }
 0x10f   : > { %438 = vst.msk [vmem:[%s260_s8] sm:$0xf] %vm265_vm9, %v587_v36 }
 0x110   : > { %658 = vrcp.f32 %v412_v37  ;;  %v424_v41 = vand.u32 2147483648, %v412_v37  ;;  %v422_v43 = vand.u32 2147483647, %v412_v37  ;;  %vm418_vm14 = vweird.f32 %v412_v37 }
 0x112   : > { %v425_v45 = vor.u32 1.1754944e-38, %v424_v41  ;;  %vm423_vm0 = vcmp.eq.f32.partialorder %v422_v43, 8.507059e+37 }
 0x116   : > { %v659_v38 = vpop.eup %658 }
 0x117   : > { %v414_v39 = vmul.f32 %v659_v38, %v412_v37  ;;  %vm419_vm13 = vweird.f32 %v659_v38 }
 0x118   : > { %vm420_vm15 = vmor %vm418_vm14, %vm419_vm13 }
 0x119   : > { %v415_v40 = vsub.f32 1.0, %v414_v39 }
 0x11b   : > { %v416_v42 = vmul.f32 %v659_v38, %v415_v40 }
 0x11d   : > { %v417_v44 = vadd.f32 %v659_v38, %v416_v42 }
 0x11f   : > { %v421_v46 = vsel %vm420_vm15, %v659_v38, %v417_v44 }
 0x120   : > { %v426_v47 = vsel %vm423_vm0, %v425_v45, %v421_v46 }
 0x121   : > { %v427_v48 = vmul.f32 %v426_v47, %v408_v31 }
 0x123   : > { %v428_v49 = vadd.f32 1e-10, %v427_v48 }
 0x125   : > { %660 = vlog2.f32 %v428_v49 }
 0x12b   : > { %v661_v50 = vpop.eup %660 }
 0x12c   : > { %v430_v51 = vmul.f32 0.6931472, %v661_v50 }
 0x12e   : > { %v431_v52 = vsub.f32 0.0, %v430_v51 }
 0x130   : > { %v432_v53 = vmul.f32 0.4342945, %v431_v52 }
 0x132   : > { %433 = vst.msk [vmem:[%s256_s11] sm:$0xf] %vm265_vm9, %v432_v53 }
 0x133 PF: > { %s20_s17 = sadd.s32 1, %s776_s17   ;;  %s943_s12 = smov %s760_s13 }
 0x134   : > { %p17_p0 = scmp.ge.s32.totalorder %s20_s17, 4   ;;  %s944_s13 = smov %s764_s14 }
 0x135   : > { %s945_s14 = smov %s848_s24  ;;  %s946_s15 = smov %s772_s16 }
 0x136   : > { %s947_s16 = smov %s949_s19  ;;  %19 = sbr.rel (!%p17_p0) target bundleno = 6 (0x6), region = 101 }
 0x13b   :  { %472 = vsyncpa [#allocation6], 1 }
 0x13c   :  { %474 = vsyncpa [#allocation6 + $0x1], 1 }
 0x13d   :  { %475 = vsyncpa [#allocation8], 1 }
 0x13e   :  { %477 = vsyncpa [#allocation8 + $0x1], 1 }

</bundles_post_ra>
